<compile_context>
chip_gen: v7x
topology: tpu7x:2x2x1
jax: 0.10.0
libtpu: 0.0.40
codegen_flags: <defaults>
</compile_context>

<pallas_src>
from functools import partial

import jax
import jax.numpy as jnp
from jax import lax
from jax.experimental import pallas as pl
from jax.experimental.pallas import tpu as pltpu


def _make_conv_block_kernel(*, F, C_in, K, pool, T_out, R_slab,
                            use_halo_input, compute_dtype):
    """Per-tile kernel.

    Refs (tiled):   a_ref (1, pool*C_in, T_out)   current phase-split tile
                    b_ref (1, pool*C_in, 128)     next 128 columns (conv halo)
                    w_ref (2F, R_slab)            [BN*conv|shift ; res|bias] (+0 pad)
                    o_ref (1, F, T_out)           pooled output tile
                    slab  (pool, R_slab, T_out)   VMEM im2col scratch
    Whole-row mode: a_ref last dim is T_out + H and b_ref is absent.
    """
    KC = K * C_in

    def body(a_ref, b_ref, w_ref, o_ref, slab_ref):
        pooled = None
        for p in range(pool):
            # ---- im2col into VMEM: static, contiguous lane slices only ----
            # slab row (k*C_in + c), col jj == x_pad[c, (jj*pool + p) + k]
            #   = phase plane q=(p+k)%pool, channel c, col jj + (p+k)//pool
            slab_ref[p, KC:R_slab, :] = jnp.ones((R_slab - KC, T_out),
                                                 compute_dtype)  # bias row(s)
            for k in range(K):
                q, d = (p + k) % pool, (p + k) // pool
                r0, r1 = q * C_in, (q + 1) * C_in
                s0, s1 = k * C_in, (k + 1) * C_in
                if (not use_halo_input) or d == 0:
                    slab_ref[p, s0:s1, :] = a_ref[0, r0:r1, d:d + T_out]
                else:
                    # last d columns of the window come from the halo block
                    slab_ref[p, s0:s1, :T_out - d] = a_ref[0, r0:r1, d:]
                    slab_ref[p, s0:s1, T_out - d:] = b_ref[0, r0:r1, :d]

            # ---- single MXU push per pool phase: conv(+BN)+bias & residual
            y = jnp.dot(w_ref[...], slab_ref[p, :, :],
                        preferred_element_type=jnp.float32)      # (2F, T_out)
            z = jnp.maximum(y[:F], 0.0) + y[F:]   # BN->ReLU, + residual branch
            pooled = z if pooled is None else jnp.maximum(pooled, z)

        o_ref[0, :, :] = pooled.astype(o_ref.dtype)

    if use_halo_input:
        def kernel(a_ref, b_ref, w_ref, o_ref, slab_ref):
            body(a_ref, b_ref, w_ref, o_ref, slab_ref)
    else:
        def kernel(a_ref, w_ref, o_ref, slab_ref):
            body(a_ref, None, w_ref, o_ref, slab_ref)
    return kernel


@partial(jax.jit, static_argnames=("pool", "compute_dtype", "max_tile"))
def conv_block_forward(x_ncl, w, gamma, beta, rmean, rvar, wres, bres,
                       pool=2, eps=1e-5, compute_dtype=jnp.bfloat16,
                       max_tile=1024):
    """ConvBlock forward (inference). x_ncl: (N, C_in, L) -> (N, F, L//pool)."""
    N, C_in, L = x_ncl.shape
    F, _, K = w.shape
    assert K % 2 == 1, "'same' padding matches PyTorch only for odd K"
    assert L % pool == 0, "MaxPool tail handling not implemented"
    pad_left = (K - 1) // 2
    L_out = L // pool
    KC = K * C_in
    H = -(-(K - 1) // pool)                 # conv halo, in phase-plane columns
    L_phase = L_out + H

    # Slab rows = K*C_in taps + 1 ones row (bias), padded to the sub-32-bit
    # packing factor so every in-kernel store stays sublane-aligned.
    pack = max(1, 4 // jnp.dtype(compute_dtype).itemsize)
    R_slab = -(-(KC + 1) // pack) * pack

    # ---- fold BN (inference) into conv weights, stack the residual 1x1 conv,
    #      append the bias column (bias is matmul-folded via a ones row) ------
    inv_std = gamma / jnp.sqrt(rvar + eps)
    w_conv = jnp.transpose(w * inv_std[:, None, None], (0, 2, 1)).reshape(F, KC)
    shift = beta - rmean * inv_std
    # The residual 1x1 conv sees the un-padded input == the k == pad_left tap.
    w_res = jnp.zeros((F, KC), jnp.float32)
    w_res = w_res.at[:, pad_left * C_in:(pad_left + 1) * C_in].set(wres[:, :, 0])
    w_all = jnp.concatenate(
        [jnp.concatenate([w_conv, shift[:, None]], axis=1),
         jnp.concatenate([w_res, bres[:, None]], axis=1)], axis=0)  # (2F, KC+1)
    w_all = jnp.pad(w_all, ((0, 0), (0, R_slab - (KC + 1)))).astype(compute_dtype)

    # ---- pool-phase split of the padded input (single 1x-sized pass) --------
    # x_phase[n, q*C_in + c, j] = x_pad[n, c, j*pool + q]
    pad_total = L_phase * pool - L
    x_pad = jnp.pad(x_ncl.astype(compute_dtype),
                    ((0, 0), (0, 0), (pad_left, pad_total - pad_left)))
    x_phase = jnp.transpose(x_pad.reshape(N, C_in, L_phase, pool),
                            (0, 3, 1, 2)).reshape(N, pool * C_in, L_phase)

    tiled = (L_out % 128 == 0)
    if tiled:
        T_out = 128
        while T_out * 2 <= max_tile and L_out % (T_out * 2) == 0:
            T_out *= 2
        assert H <= 128, "conv halo larger than one 128-lane halo block"
        num_tiles = L_out // T_out
        grid = (N, num_tiles)
        use_halo = H > 0
        in_specs = [pl.BlockSpec((1, pool * C_in, T_out), lambda n, t: (n, 0, t))]
        args = [x_phase]
        if use_halo:
            in_specs.append(pl.BlockSpec(
                (1, pool * C_in, 128),
                lambda n, t: (n, 0, (t + 1) * (T_out // 128))))
            args.append(x_phase)
        in_specs.append(pl.BlockSpec((2 * F, R_slab), lambda n, t: (0, 0)))
        args.append(w_all)
        out_specs = pl.BlockSpec((1, F, T_out), lambda n, t: (n, 0, t))
        semantics = ("parallel", "parallel")     # v7x: shard over both cores
    else:
        # Small / non-128-multiple L_out: one lane-dense step per batch row.
        T_out = L_out
        use_halo = False
        grid = (N,)
        in_specs = [
            pl.BlockSpec((1, pool * C_in, L_phase), lambda n: (n, 0, 0)),
            pl.BlockSpec((2 * F, R_slab), lambda n: (0, 0)),
        ]
        args = [x_phase, w_all]
        out_specs = pl.BlockSpec((1, F, L_out), lambda n: (n, 0, 0))
        semantics = ("parallel",)

    kernel = _make_conv_block_kernel(
        F=F, C_in=C_in, K=K, pool=pool, T_out=T_out, R_slab=R_slab,
        use_halo_input=use_halo, compute_dtype=compute_dtype)

    cost = pl.CostEstimate(
        flops=2 * (2 * F) * R_slab * pool * L_out * N,
        transcendentals=0,
        bytes_accessed=(x_phase.size * x_phase.dtype.itemsize
                        + w_all.size * w_all.dtype.itemsize
                        + N * F * L_out * 4))

    out = pl.pallas_call(
        kernel,
        out_shape=jax.ShapeDtypeStruct((N, F, L_out), jnp.float32),
        grid=grid,
        in_specs=in_specs,
        out_specs=out_specs,
        scratch_shapes=[pltpu.VMEM((pool, R_slab, T_out), compute_dtype)],
        compiler_params=pltpu.CompilerParams(
            dimension_semantics=semantics,
            # Raise v5e's 16 MiB scoped default; stays under v7x's 64 MiB
            # physical VMEM.  Per-step working set here is << 1 MiB.
            vmem_limit_bytes=32 * 1024 * 1024),
        cost_estimate=cost,
    )(*args)

    return out.astype(x_ncl.dtype)


def reference(x, w, gamma, beta, rmean, rvar, wres, bres, pool=2, eps=1e-5):
    """Pure-JAX reference mirroring the PyTorch forward (eval mode)."""
    y = lax.conv_general_dilated(x, w, (1,), 'SAME',
                                 dimension_numbers=('NCH', 'OIH', 'NCH'))
    y = (y - rmean[None, :, None]) / jnp.sqrt(rvar + eps)[None, :, None]
    y = y * gamma[None, :, None] + beta[None, :, None]
    y = jnp.maximum(y, 0.0)
    res = jnp.einsum('ncl,fc->nfl', x, wres[:, :, 0]) + bres[None, :, None]
    y = y + res
    N, F_, L = y.shape
    return y.reshape(N, F_, L // pool, pool).max(-1)


if __name__ == "__main__":
    # ConvBlock(filters=8, kernel_size=5, in_channels=4, pool_size=2,
    #           activation='relu', dropout=0.25, res=True) -- inference mode.
    N, C_in, L = 2, 4, 16
    F, K, POOL = 8, 5, 2

    key = jax.random.PRNGKey(0)
    ks = jax.random.split(key, 9)
    x = jax.random.normal(ks[0], (N, C_in, L), jnp.float32)
    w = 0.1 * jax.random.normal(ks[1], (F, C_in, K), jnp.float32)     # conv w
    gamma = 1.0 + 0.1 * jax.random.normal(ks[2], (F,), jnp.float32)   # bn weight
    beta = 0.1 * jax.random.normal(ks[3], (F,), jnp.float32)          # bn bias
    rmean = 0.05 * jax.random.normal(ks[4], (F,), jnp.float32)        # bn mean
    rvar = 1.0 + 0.1 * jax.random.uniform(ks[5], (F,), jnp.float32)   # bn var
    wres = 0.1 * jax.random.normal(ks[6], (F, C_in, 1), jnp.float32)  # res w
    bres = 0.1 * jax.random.normal(ks[7], (F,), jnp.float32)          # res bias
    params = (w, gamma, beta, rmean, rvar, wres, bres)

    # Small shape -> single-block path.  bf16 MXU feeds -> loosened tolerance.
    out = jax.block_until_ready(conv_block_forward(x, *params, pool=POOL))
    ref = reference(x, *params, pool=POOL)
    assert out.shape == (N, F, L // POOL), out.shape
    assert jnp.allclose(out, ref, rtol=5e-2, atol=5e-2), \
        float(jnp.max(jnp.abs(out - ref)))

    # Larger shape -> tiled path (multiple 128-multiple lane tiles, halo
    # window input, fully "parallel" 2-D grid), checked against the same ref.
    L2 = 1024
    x2 = jax.random.normal(ks[8], (N, C_in, L2), jnp.float32)
    out2 = jax.block_until_ready(
        conv_block_forward(x2, *params, pool=POOL, max_tile=256))
    ref2 = reference(x2, *params, pool=POOL)
    assert out2.shape == (N, F, L2 // POOL), out2.shape
    assert jnp.allclose(out2, ref2, rtol=5e-2, atol=5e-2), \
        float(jnp.max(jnp.abs(out2 - ref2)))

    print("KERNEL_OK")
</pallas_src>

<mosaic_0001>
module attributes {stable_mosaic.version = 11 : i64} {
  func.func @kernel(%arg0: i32, %arg1: memref<1x8x10xbf16, #tpu.memory_space<vmem>>, %arg2: memref<16x22xbf16, #tpu.memory_space<vmem>>, %arg3: memref<1x8x8xf32, #tpu.memory_space<vmem>>, %arg4: memref<2x22x8xbf16, #tpu.memory_space<vmem>>) attributes {dimension_semantics = [#tpu.dimension_semantics<parallel>], iteration_bounds = array<i64: 2>, scalar_prefetch = 0 : i64, scratch_operands = 1 : i64, tpu.core_type = #tpu.core_type<tc>, window_params = [{transform_indices = @transform_0, window_bounds = array<i64: 1, 8, 10>}, {pipeline_mode = #tpu.pipeline_mode<synchronous>, transform_indices = @transform_1, window_bounds = array<i64: 16, 22>}, {transform_indices = @transform_2, window_bounds = array<i64: 1, 8, 8>}]} {
    %cst = arith.constant 1.000000e+00 : bf16
    %0 = vector.broadcast %cst : bf16 to vector<2x8xbf16>
    %c0 = arith.constant 0 : index
    %c20 = arith.constant 20 : index
    %c0_0 = arith.constant 0 : index
    %1 = vector.load %arg4[%c0, %c20, %c0_0] : memref<2x22x8xbf16, #tpu.memory_space<vmem>>, vector<1x2x8xbf16>
    %2 = vector.shape_cast %1 : vector<1x2x8xbf16> to vector<2x8xbf16>
    %3 = vector.shape_cast %0 : vector<2x8xbf16> to vector<1x2x8xbf16>
    tpu.vector_store %arg4[%c0, %c20, %c0_0], %3 {strides = array<i32>} : memref<2x22x8xbf16, #tpu.memory_space<vmem>>, vector<1x2x8xbf16>,
    %c0_1 = arith.constant 0 : index
    %c0_2 = arith.constant 0 : index
    %c0_3 = arith.constant 0 : index
    %4 = vector.load %arg1[%c0_1, %c0_2, %c0_3] : memref<1x8x10xbf16, #tpu.memory_space<vmem>>, vector<1x4x8xbf16>
    %5 = vector.shape_cast %4 : vector<1x4x8xbf16> to vector<4x8xbf16>
    %c0_4 = arith.constant 0 : index
    %c0_5 = arith.constant 0 : index
    %c0_6 = arith.constant 0 : index
    %6 = vector.load %arg4[%c0_4, %c0_5, %c0_6] : memref<2x22x8xbf16, #tpu.memory_space<vmem>>, vector<1x4x8xbf16>
    %7 = vector.shape_cast %6 : vector<1x4x8xbf16> to vector<4x8xbf16>
    %8 = vector.shape_cast %5 : vector<4x8xbf16> to vector<1x4x8xbf16>
    tpu.vector_store %arg4[%c0_4, %c0_5, %c0_6], %8 {strides = array<i32>} : memref<2x22x8xbf16, #tpu.memory_space<vmem>>, vector<1x4x8xbf16>,
    %c0_7 = arith.constant 0 : index
    %c4 = arith.constant 4 : index
    %c0_8 = arith.constant 0 : index
    %9 = vector.load %arg1[%c0_7, %c4, %c0_8] : memref<1x8x10xbf16, #tpu.memory_space<vmem>>, vector<1x4x8xbf16>
    %10 = vector.shape_cast %9 : vector<1x4x8xbf16> to vector<4x8xbf16>
    %c0_9 = arith.constant 0 : index
    %c4_10 = arith.constant 4 : index
    %c0_11 = arith.constant 0 : index
    %11 = vector.load %arg4[%c0_9, %c4_10, %c0_11] : memref<2x22x8xbf16, #tpu.memory_space<vmem>>, vector<1x4x8xbf16>
    %12 = vector.shape_cast %11 : vector<1x4x8xbf16> to vector<4x8xbf16>
    %13 = vector.shape_cast %10 : vector<4x8xbf16> to vector<1x4x8xbf16>
    tpu.vector_store %arg4[%c0_9, %c4_10, %c0_11], %13 {strides = array<i32>} : memref<2x22x8xbf16, #tpu.memory_space<vmem>>, vector<1x4x8xbf16>,
    %c0_12 = arith.constant 0 : index
    %c0_13 = arith.constant 0 : index
    %c1 = arith.constant 1 : index
    %14 = vector.load %arg1[%c0_12, %c0_13, %c1] : memref<1x8x10xbf16, #tpu.memory_space<vmem>>, vector<1x4x8xbf16>
    %15 = vector.shape_cast %14 : vector<1x4x8xbf16> to vector<4x8xbf16>
    %c0_14 = arith.constant 0 : index
    %c8 = arith.constant 8 : index
    %c0_15 = arith.constant 0 : index
    %16 = vector.load %arg4[%c0_14, %c8, %c0_15] : memref<2x22x8xbf16, #tpu.memory_space<vmem>>, vector<1x4x8xbf16>
    %17 = vector.shape_cast %16 : vector<1x4x8xbf16> to vector<4x8xbf16>
    %18 = vector.shape_cast %15 : vector<4x8xbf16> to vector<1x4x8xbf16>
    tpu.vector_store %arg4[%c0_14, %c8, %c0_15], %18 {strides = array<i32>} : memref<2x22x8xbf16, #tpu.memory_space<vmem>>, vector<1x4x8xbf16>,
    %c0_16 = arith.constant 0 : index
    %c4_17 = arith.constant 4 : index
    %c1_18 = arith.constant 1 : index
    %19 = vector.load %arg1[%c0_16, %c4_17, %c1_18] : memref<1x8x10xbf16, #tpu.memory_space<vmem>>, vector<1x4x8xbf16>
    %20 = vector.shape_cast %19 : vector<1x4x8xbf16> to vector<4x8xbf16>
    %c0_19 = arith.constant 0 : index
    %c12 = arith.constant 12 : index
    %c0_20 = arith.constant 0 : index
    %21 = vector.load %arg4[%c0_19, %c12, %c0_20] : memref<2x22x8xbf16, #tpu.memory_space<vmem>>, vector<1x4x8xbf16>
    %22 = vector.shape_cast %21 : vector<1x4x8xbf16> to vector<4x8xbf16>
    %23 = vector.shape_cast %20 : vector<4x8xbf16> to vector<1x4x8xbf16>
    tpu.vector_store %arg4[%c0_19, %c12, %c0_20], %23 {strides = array<i32>} : memref<2x22x8xbf16, #tpu.memory_space<vmem>>, vector<1x4x8xbf16>,
    %c0_21 = arith.constant 0 : index
    %c0_22 = arith.constant 0 : index
    %c2 = arith.constant 2 : index
    %24 = vector.load %arg1[%c0_21, %c0_22, %c2] : memref<1x8x10xbf16, #tpu.memory_space<vmem>>, vector<1x4x8xbf16>
    %25 = vector.shape_cast %24 : vector<1x4x8xbf16> to vector<4x8xbf16>
    %c0_23 = arith.constant 0 : index
    %c16 = arith.constant 16 : index
    %c0_24 = arith.constant 0 : index
    %26 = vector.load %arg4[%c0_23, %c16, %c0_24] : memref<2x22x8xbf16, #tpu.memory_space<vmem>>, vector<1x4x8xbf16>
    %27 = vector.shape_cast %26 : vector<1x4x8xbf16> to vector<4x8xbf16>
    %28 = vector.shape_cast %25 : vector<4x8xbf16> to vector<1x4x8xbf16>
    tpu.vector_store %arg4[%c0_23, %c16, %c0_24], %28 {strides = array<i32>} : memref<2x22x8xbf16, #tpu.memory_space<vmem>>, vector<1x4x8xbf16>,
    %c0_25 = arith.constant 0 : index
    %c0_26 = arith.constant 0 : index
    %29 = vector.load %arg2[%c0_25, %c0_26] : memref<16x22xbf16, #tpu.memory_space<vmem>>, vector<16x22xbf16>
    %c0_27 = arith.constant 0 : index
    %c0_28 = arith.constant 0 : index
    %c0_29 = arith.constant 0 : index
    %30 = vector.load %arg4[%c0_27, %c0_28, %c0_29] : memref<2x22x8xbf16, #tpu.memory_space<vmem>>, vector<1x22x8xbf16>
    %31 = vector.shape_cast %30 : vector<1x22x8xbf16> to vector<22x8xbf16>
    %cst_30 = arith.constant dense<0.000000e+00> : vector<16x8xf32>
    %32 = tpu.matmul %29, %31, %cst_30 {dimension_numbers = #tpu.dot_dimension_numbers<[1], [0], [0], [1], [0, 0, 1, 1], [], []>} : vector<16x22xbf16>, vector<22x8xbf16>, vector<16x8xf32> -> vector<16x8xf32>
    %33 = vector.extract_strided_slice %32 {offsets = [0, 0], sizes = [8, 8], strides = [1, 1]} : vector<16x8xf32> to vector<8x8xf32>
    %cst_31 = arith.constant 0.000000e+00 : f32
    %34 = vector.broadcast %cst_31 : f32 to vector<8x8xf32>
    %35 = arith.maximumf %33, %34 : vector<8x8xf32>
    %36 = vector.extract_strided_slice %32 {offsets = [8, 0], sizes = [8, 8], strides = [1, 1]} : vector<16x8xf32> to vector<8x8xf32>
    %37 = arith.addf %35, %36 : vector<8x8xf32>
    %cst_32 = arith.constant 1.000000e+00 : bf16
    %38 = vector.broadcast %cst_32 : bf16 to vector<2x8xbf16>
    %c1_33 = arith.constant 1 : index
    %c20_34 = arith.constant 20 : index
    %c0_35 = arith.constant 0 : index
    %39 = vector.load %arg4[%c1_33, %c20_34, %c0_35] : memref<2x22x8xbf16, #tpu.memory_space<vmem>>, vector<1x2x8xbf16>
    %40 = vector.shape_cast %39 : vector<1x2x8xbf16> to vector<2x8xbf16>
    %41 = vector.shape_cast %38 : vector<2x8xbf16> to vector<1x2x8xbf16>
    tpu.vector_store %arg4[%c1_33, %c20_34, %c0_35], %41 {strides = array<i32>} : memref<2x22x8xbf16, #tpu.memory_space<vmem>>, vector<1x2x8xbf16>,
    %c0_36 = arith.constant 0 : index
    %c4_37 = arith.constant 4 : index
    %c0_38 = arith.constant 0 : index
    %42 = vector.load %arg1[%c0_36, %c4_37, %c0_38] : memref<1x8x10xbf16, #tpu.memory_space<vmem>>, vector<1x4x8xbf16>
    %43 = vector.shape_cast %42 : vector<1x4x8xbf16> to vector<4x8xbf16>
    %c1_39 = arith.constant 1 : index
    %c0_40 = arith.constant 0 : index
    %c0_41 = arith.constant 0 : index
    %44 = vector.load %arg4[%c1_39, %c0_40, %c0_41] : memref<2x22x8xbf16, #tpu.memory_space<vmem>>, vector<1x4x8xbf16>
    %45 = vector.shape_cast %44 : vector<1x4x8xbf16> to vector<4x8xbf16>
    %46 = vector.shape_cast %43 : vector<4x8xbf16> to vector<1x4x8xbf16>
    tpu.vector_store %arg4[%c1_39, %c0_40, %c0_41], %46 {strides = array<i32>} : memref<2x22x8xbf16, #tpu.memory_space<vmem>>, vector<1x4x8xbf16>,
    %c0_42 = arith.constant 0 : index
    %c0_43 = arith.constant 0 : index
    %c1_44 = arith.constant 1 : index
    %47 = vector.load %arg1[%c0_42, %c0_43, %c1_44] : memref<1x8x10xbf16, #tpu.memory_space<vmem>>, vector<1x4x8xbf16>
    %48 = vector.shape_cast %47 : vector<1x4x8xbf16> to vector<4x8xbf16>
    %c1_45 = arith.constant 1 : index
    %c4_46 = arith.constant 4 : index
    %c0_47 = arith.constant 0 : index
    %49 = vector.load %arg4[%c1_45, %c4_46, %c0_47] : memref<2x22x8xbf16, #tpu.memory_space<vmem>>, vector<1x4x8xbf16>
    %50 = vector.shape_cast %49 : vector<1x4x8xbf16> to vector<4x8xbf16>
    %51 = vector.shape_cast %48 : vector<4x8xbf16> to vector<1x4x8xbf16>
    tpu.vector_store %arg4[%c1_45, %c4_46, %c0_47], %51 {strides = array<i32>} : memref<2x22x8xbf16, #tpu.memory_space<vmem>>, vector<1x4x8xbf16>,
    %c0_48 = arith.constant 0 : index
    %c4_49 = arith.constant 4 : index
    %c1_50 = arith.constant 1 : index
    %52 = vector.load %arg1[%c0_48, %c4_49, %c1_50] : memref<1x8x10xbf16, #tpu.memory_space<vmem>>, vector<1x4x8xbf16>
    %53 = vector.shape_cast %52 : vector<1x4x8xbf16> to vector<4x8xbf16>
    %c1_51 = arith.constant 1 : index
    %c8_52 = arith.constant 8 : index
    %c0_53 = arith.constant 0 : index
    %54 = vector.load %arg4[%c1_51, %c8_52, %c0_53] : memref<2x22x8xbf16, #tpu.memory_space<vmem>>, vector<1x4x8xbf16>
    %55 = vector.shape_cast %54 : vector<1x4x8xbf16> to vector<4x8xbf16>
    %56 = vector.shape_cast %53 : vector<4x8xbf16> to vector<1x4x8xbf16>
    tpu.vector_store %arg4[%c1_51, %c8_52, %c0_53], %56 {strides = array<i32>} : memref<2x22x8xbf16, #tpu.memory_space<vmem>>, vector<1x4x8xbf16>,
    %c0_54 = arith.constant 0 : index
    %c0_55 = arith.constant 0 : index
    %c2_56 = arith.constant 2 : index
    %57 = vector.load %arg1[%c0_54, %c0_55, %c2_56] : memref<1x8x10xbf16, #tpu.memory_space<vmem>>, vector<1x4x8xbf16>
    %58 = vector.shape_cast %57 : vector<1x4x8xbf16> to vector<4x8xbf16>
    %c1_57 = arith.constant 1 : index
    %c12_58 = arith.constant 12 : index
    %c0_59 = arith.constant 0 : index
    %59 = vector.load %arg4[%c1_57, %c12_58, %c0_59] : memref<2x22x8xbf16, #tpu.memory_space<vmem>>, vector<1x4x8xbf16>
    %60 = vector.shape_cast %59 : vector<1x4x8xbf16> to vector<4x8xbf16>
    %61 = vector.shape_cast %58 : vector<4x8xbf16> to vector<1x4x8xbf16>
    tpu.vector_store %arg4[%c1_57, %c12_58, %c0_59], %61 {strides = array<i32>} : memref<2x22x8xbf16, #tpu.memory_space<vmem>>, vector<1x4x8xbf16>,
    %c0_60 = arith.constant 0 : index
    %c4_61 = arith.constant 4 : index
    %c2_62 = arith.constant 2 : index
    %62 = vector.load %arg1[%c0_60, %c4_61, %c2_62] : memref<1x8x10xbf16, #tpu.memory_space<vmem>>, vector<1x4x8xbf16>
    %63 = vector.shape_cast %62 : vector<1x4x8xbf16> to vector<4x8xbf16>
    %c1_63 = arith.constant 1 : index
    %c16_64 = arith.constant 16 : index
    %c0_65 = arith.constant 0 : index
    %64 = vector.load %arg4[%c1_63, %c16_64, %c0_65] : memref<2x22x8xbf16, #tpu.memory_space<vmem>>, vector<1x4x8xbf16>
    %65 = vector.shape_cast %64 : vector<1x4x8xbf16> to vector<4x8xbf16>
    %66 = vector.shape_cast %63 : vector<4x8xbf16> to vector<1x4x8xbf16>
    tpu.vector_store %arg4[%c1_63, %c16_64, %c0_65], %66 {strides = array<i32>} : memref<2x22x8xbf16, #tpu.memory_space<vmem>>, vector<1x4x8xbf16>,
    %c0_66 = arith.constant 0 : index
    %c0_67 = arith.constant 0 : index
    %67 = vector.load %arg2[%c0_66, %c0_67] : memref<16x22xbf16, #tpu.memory_space<vmem>>, vector<16x22xbf16>
    %c1_68 = arith.constant 1 : index
    %c0_69 = arith.constant 0 : index
    %c0_70 = arith.constant 0 : index
    %68 = vector.load %arg4[%c1_68, %c0_69, %c0_70] : memref<2x22x8xbf16, #tpu.memory_space<vmem>>, vector<1x22x8xbf16>
    %69 = vector.shape_cast %68 : vector<1x22x8xbf16> to vector<22x8xbf16>
    %cst_71 = arith.constant dense<0.000000e+00> : vector<16x8xf32>
    %70 = tpu.matmul %67, %69, %cst_71 {dimension_numbers = #tpu.dot_dimension_numbers<[1], [0], [0], [1], [0, 0, 1, 1], [], []>} : vector<16x22xbf16>, vector<22x8xbf16>, vector<16x8xf32> -> vector<16x8xf32>
    %71 = vector.extract_strided_slice %70 {offsets = [0, 0], sizes = [8, 8], strides = [1, 1]} : vector<16x8xf32> to vector<8x8xf32>
    %cst_72 = arith.constant 0.000000e+00 : f32
    %72 = vector.broadcast %cst_72 : f32 to vector<8x8xf32>
    %73 = arith.maximumf %71, %72 : vector<8x8xf32>
    %74 = vector.extract_strided_slice %70 {offsets = [8, 0], sizes = [8, 8], strides = [1, 1]} : vector<16x8xf32> to vector<8x8xf32>
    %75 = arith.addf %73, %74 : vector<8x8xf32>
    %76 = arith.maximumf %37, %75 : vector<8x8xf32>
    %c0_73 = arith.constant 0 : index
    %c0_74 = arith.constant 0 : index
    %c0_75 = arith.constant 0 : index
    %77 = vector.load %arg3[%c0_73, %c0_74, %c0_75] : memref<1x8x8xf32, #tpu.memory_space<vmem>>, vector<1x8x8xf32>
    %78 = vector.shape_cast %77 : vector<1x8x8xf32> to vector<8x8xf32>
    %79 = vector.shape_cast %76 : vector<8x8xf32> to vector<1x8x8xf32>
    tpu.vector_store %arg3[%c0_73, %c0_74, %c0_75], %79 {strides = array<i32>} : memref<1x8x8xf32, #tpu.memory_space<vmem>>, vector<1x8x8xf32>,
    return
  }
  func.func @transform_0(%arg0: i32) -> (i32, i32, i32) {
    %c0_i32 = arith.constant 0 : i32
    %c0_i32_0 = arith.constant 0 : i32
    %c0_i32_1 = arith.constant 0 : i32
    return %arg0, %c0_i32, %c0_i32_0 : i32, i32, i32
  }
  func.func @transform_1(%arg0: i32) -> (i32, i32) {
    %c0_i32 = arith.constant 0 : i32
    %c0_i32_0 = arith.constant 0 : i32
    %c0_i32_1 = arith.constant 0 : i32
    return %c0_i32, %c0_i32_0 : i32, i32
  }
  func.func @transform_2(%arg0: i32) -> (i32, i32, i32) {
    %c0_i32 = arith.constant 0 : i32
    %c0_i32_0 = arith.constant 0 : i32
    %c0_i32_1 = arith.constant 0 : i32
    return %arg0, %c0_i32, %c0_i32_0 : i32, i32, i32
  }
}

</mosaic_0001>

<bundles_post_ra>
// kernel: conv_block_forward.1
= control target key start
LH: loop header
LB: loop body
LE: loop exit
PB: predicated region body
PF: predicated region fallthrough
CT: control target
= control target key end

     0   :  { %7 = vsyncpa [#allocation4], 0  ;;  %s712_s0 = inlined_call_operand.vmem [shape: bf16[2,8,10], index: 0, kind: input, shape index: {}]   ;;  %s713_s1 = inlined_call_operand.vmem [shape: bf16[16,22], index: 1, kind: input, shape index: {}]   ;;  %s714_s2 = inlined_call_operand.hbm [shape: f32[2,8,8], index: 2, kind: output, shape index: {}]  }
   0x1   :  { %9 = vsyncpa [#allocation4 + $0x1], 0  ;;  %s596_s9 = smov 0   ;;  %s598_s10 = smov 0  }
   0x2   :  { %s600_s11 = smov 0   ;;  %s602_s12 = smov 0  }
   0x3 LB: > { %s617_s13 = sadd.s32 4294967295, %s574_s12   ;;  %s419_s14 = sadd.s32 4294967294, %s574_s12   ;;  %s574_s12 = sphi %s602_s12, %s720_s12   ;;  %s570_s11 = sphi %s600_s11, %s719_s11   ;;  %s566_s10 = sphi %s598_s10, %s718_s10   ;;  %s562_s9 = sphi %s596_s9, %s717_s9  }
   0x4   : > { %s621_s15 = sadd.s32 1, %s574_s12   ;;  %s69_s16 = sadd.s32 1, %s570_s11 }
   0x5   : > { %s66_s17 = ssub.s32 %s574_s12, %s621_s15  ;;  %p79_p0 = scmp.ne.s32.totalorder %s570_s11, %s566_s10 }
   0x6   : > { %p67_p1 = scmp.eq.s32.totalorder %s66_s17, 0  ;;  %p80_p2 = scmp.eq.s32.totalorder %s617_s13, 1 }
   0x7   : > { %p85_p3 = scmp.ne.s32.totalorder %s566_s10, %s562_s9  ;;  %p86_p4 = scmp.eq.s32.totalorder %s419_s14, 1 }
   0x8   : > { %s632_s18 = scalar_select %p67_p1, %s570_s11, %s69_s16  }
   0x9   : > { %p634_p5 = por %p80_p2, %p79_p0  ;;  %p638_p6 = por %p86_p4, %p85_p3 }
   0xa   : > { %p422_p7 = scmp.ge.s32.totalorder %s574_s12, 1  ;;  %p114_p8 = scmp.lt.s32.totalorder %s574_s12, 3 }
   0xc   : > { %p115_p9 = pnand %p422_p7, %p114_p8 }
   0xd   : > { %p135_p10 = scmp.lt.s32.totalorder (!%p115_p9), %s617_s13, 1  ;;  %v576_v2 = vmov (!%p115_p9), 0.0   ;;  %s577_s26 = smov (!%p115_p9), 127   ;;  %vm147_vm0 = vcmask (!%p115_p9), 60418   ;;  %vm144_vm1 = vcmask (!%p115_p9), 58368   ;;  %vm579_vm2 = vmmov (!%p115_p9), 0  }
   0xe   : > { %118 = sbr.rel (%p115_p9) target bundleno = 397 (0x18d), region = 28  ;;  %446 = vmatprep.subr.bf16.mxu0 (!%p115_p9), %v576_v2  ;;  %454 = vmatprep.subr.bf16.mxu1 (!%p115_p9), %v576_v2  ;;  %s578_s27 = smov (!%p115_p9), 126   ;;  %vm190_vm3 = vcmask (!%p115_p9), 1042432   ;;  %v510_v26 = vld [vmem:[%s713_s1] sm:$0xff] (!%p115_p9)   ;;  %vm186_vm4 = vcmask (!%p115_p9), 179200   ;;  %vm344_vm5 = vcmask (!%p115_p9), 64512  }
   0xf   : > { %450 = vmatprep.mubr.msk.bf16.mxu0 (!%p115_p9), %vm579_vm2, %v576_v2  ;;  %458 = vmatprep.mubr.msk.bf16.mxu1 (!%p115_p9), %vm579_vm2, %v576_v2  ;;  %v511_v30 = vld [vmem:[%s713_s1] sm:$0xff] (!%p115_p9)   ;;  %s132_s4 = sand.u32 (!%p115_p9), 1, %s566_s10   ;;  %s437_s6 = sshll.u32 (!%p115_p9), %s617_s13, 7 }
  0x10   : > { %s423_s5 = sshll.u32 (!%p115_p9), %s132_s4, 3  ;;  %s670_s17 = scalar_lea.hbm (!%p115_p9), %s714_s2, %s437_s6 }
  0x11   : > { %s134_s7 = scalar_lea.vmem (!%p115_p9), [#allocation3], %s423_s5 }
  0x12   : > { %s360_s8 = sshll.u32 (!%p115_p9), %s134_s7, 4  ;;  %s672_s8 = int_to_ptr.vmem [resolvable:$true] %s360_s8 }
  0x15   : > { %s136_s21 = scalar_select %p135_p10, %s617_s13, 1 }
  0x16   : > { %s580_s13 = smov [#allocation3]  }
  0x17   : > { %s424_s22 = sshll.u32 %s136_s21, 2  ;;  %s347_s21 = scalar_lea.sflag [#allocation4], %s132_s4 }
  0x18   : > { %s138_s25 = scalar_lea.vmem %s712_s0, %s424_s22  ;;  %s512_s22 = scalar_lea.vmem %s672_s8, 128 }
  0x19   : > { %v149_v0 = vld [vmem:[%s138_s25] sm:$0x3]  ;;  %v252_v4 = vld [vmem:[%s138_s25] sm:$0xc]  ;;  %p513_p11 = scmp.ne.s32.totalorder %s672_s8, %s512_s22  ;;  %s516_s23 = sshll.u32 %s580_s13, 4  ;;  %s517_s23 = int_to_ptr.vmem [resolvable:$false] %s516_s23 }
  0x1a   : > { %v245_v1 = vld [vmem:[%s138_s25] sm:$0x3]  ;;  %151 = vrot.lane.b32.xlu0 %v149_v0, %s577_s26  ;;  %v155_v5 = vld [vmem:[%s138_s25] sm:$0xc]  ;;  %v430_v7 = vrot.slane %v252_v4, 10  ;;  %s518_s24 = scalar_lea.vmem %s517_s23, 256  ;;  %p519_p0 = scmp.lt.s32.totalorder %s672_s8, %s517_s23 }
  0x1b   : > { %v247_v3 = vrot.slane %v245_v1, 6  ;;  %v260_v6 = vld [vmem:[%s138_s25] sm:$0x3]  ;;  %v239_v8 = vld [vmem:[%s138_s25] sm:$0xc]  ;;  %p514_p12 = pnand %p513_p11, %p634_p5  ;;  %p520_p1 = scmp.lt.s32.totalorder %s518_s24, %s512_s22 }
  0x1c   : > { %v143_v9 = vld [vmem:[%s138_s25] sm:$0x3]  ;;  %v429_v10 = vrot.slane %v239_v8, 10  ;;  %v146_v11 = vld [vmem:[%s138_s25] sm:$0xc]  ;;  %v262_v12 = vrot.slane %v260_v6, 6 }
  0x1d   : > { %248 = vrot.lane.b32.xlu1 %v247_v3, %s577_s26  ;;  %145 = vst.msk [vmem:[#allocation2] sm:$0x3] %vm144_vm1, %v143_v9  ;;  %v267_v13 = vld [vmem:[%s138_s25] sm:$0xc]  ;;  %v161_v14 = vld [vmem:[%s138_s25] sm:$0x3]  ;;  %p515_p13 = pneg %p514_p12  ;;  %p521_p2 = por %p520_p1, %p519_p0 }
  0x1e   : > { %157 = vrot.lane.b32.xlu0 %v155_v5, %s577_s26  ;;  %148 = vst.msk [vmem:[#allocation2] sm:$0xc] %vm147_vm0, %v146_v11  ;;  %v431_v15 = vrot.slane %v267_v13, 10 }
  0x1f   : > { %244 = vst.msk [vmem:[#allocation2 + $0xc] sm:$0x3] %vm144_vm1, %v429_v10  ;;  %p522_p3 = pnand %p521_p2, %p515_p13 }
  0x21   : > { %256 = vrot.lane.b32.xlu1 %v430_v7, %s577_s26 }
  0x22   : > { %263 = vrot.lane.b32.xlu0 %v262_v12, %s578_s27 }
  0x25   : > { %163 = vrot.lane.b32.xlu1 %v161_v14, %s578_s27 }
  0x26   : > { %271 = vrot.lane.b32.xlu0 %v431_v15, %s578_s27 }
  0x8c   : > { %v152_v16 = vpop.permute.xlu0 %151 }
  0x8d   : > { %154 = vst.msk [vmem:[#allocation2 + $0x4] sm:$0x3] %vm144_vm1, %v152_v16 }
  0x8f   : > { %v249_v17 = vpop.permute.xlu1 %248 }
  0x90   : > { %251 = vst.msk [vmem:[#allocation2 + $0xc] sm:$0xc] %vm147_vm0, %v249_v17  ;;  %v158_v18 = vpop.permute.xlu0 %157 }
  0x91   : > { %160 = vst.msk [vmem:[#allocation2 + $0x4] sm:$0xc] %vm147_vm0, %v158_v18 }
  0x93   : > { %v257_v19 = vpop.permute.xlu1 %256 }
  0x94   : > { %259 = vst.msk [vmem:[#allocation2 + $0x10] sm:$0x3] %vm144_vm1, %v257_v19  ;;  %v264_v20 = vpop.permute.xlu0 %263 }
  0x95   : > { %266 = vst.msk [vmem:[#allocation2 + $0x10] sm:$0xc] %vm147_vm0, %v264_v20 }
  0x97   : > { %v164_v21 = vpop.permute.xlu1 %163 }
  0x98   : > { %166 = vst.msk [vmem:[#allocation2 + $0x8] sm:$0x3] %vm144_vm1, %v164_v21  ;;  %v272_v22 = vpop.permute.xlu0 %271  ;;  %v506_v23 = vld [vmem:[#allocation2] sm:$0xff]  }
  0x99   : > { %274 = vst.msk [vmem:[#allocation2 + $0x14] sm:$0x3] %vm144_vm1, %v272_v22  ;;  %447 = vmatpush3.bf16.msra.mxu0 %v506_v23 }
  0x9a   : > { %448 = vmatprep.subr.bf16.mxu0 %v576_v2 }
  0x9c   : > { %v507_v24 = vld [vmem:[#allocation2 + $0xc] sm:$0xff]  }
  0x9d   : > { %455 = vmatpush3.bf16.msra.mxu1 %v507_v24 }
  0x9e   : > { %456 = vmatprep.subr.bf16.mxu1 %v576_v2 }
  0x9f   : > { %v508_v25 = vld [vmem:[#allocation2 + $0x8] ss:$0 sps:$4 sm:$0x77]  }
  0xa0   : > { %v192_v27 = vsel %vm190_vm3, %v508_v25, 0  ;;  %v509_v28 = vld [vmem:[#allocation2 + $0x14] ss:$0 sps:$4 sm:$0x77]  }
  0xa1   : > { %449 = vmatpush3.bf16.msra.mxu0 %v192_v27  ;;  %v298_v29 = vsel %vm190_vm3, %v509_v28, 0 }
  0xa2   : > { %457 = vmatpush3.bf16.msra.mxu1 %v298_v29 }
  0xa4   : > { %451 = vmatmul.mubr.msk.bf16.vlgmr.msra.gmra.mrb[0].mxu0 %vm186_vm4, %v510_v26 }
  0xa5   : > { %459 = vmatmul.mubr.msk.bf16.vlgmr.msra.gmra.mrb[0].mxu1 %vm186_vm4, %v511_v30 }
 0x177   : > { %v228_v31 = vpop.f32.mrb[0].mxu0 }
 0x178   : > { %v235_v32 = vmax.f32 %v228_v31, 0.0  ;;  %v452_v33 = vpop.f32.mrb[1].mxu0  ;;  %v334_v35 = vpop.f32.mrb[0].mxu1 }
 0x179   : > { %v231_v34 = vpop.f32.mrb[2].mxu0  ;;  %v341_v37 = vmax.f32 %v334_v35, 0.0  ;;  %v460_v39 = vpop.f32.mrb[1].mxu1 }
 0x17a   : > { %v236_v36 = vadd.f32 %v235_v32, %v231_v34  ;;  %v453_v38 = vpop.f32.mrb[3].mxu0  ;;  %v337_v40 = vpop.f32.mrb[2].mxu1 }
 0x17b   : > { %v342_v41 = vadd.f32 %v341_v37, %v337_v40  ;;  %v461_v42 = vpop.f32.mrb[3].mxu1 }
 0x17d   : > { %v343_v43 = vmax.f32 %v236_v36, %v342_v41 }
 0x17f   : > { %345 = vst.msk [vmem:[%s134_s7] sm:$0xff] %vm344_vm5, %v343_v43 }
 0x180   : > { %525 = shalt.err (!%p522_p3)
}
 0x181   : > { %s526_s25 = scalar_lea.hbm %s670_s17, 128  ;;  %s530_s28 = scalar_lea.hbm %s714_s2, 256 }
 0x182   : > { %p527_p4 = scmp.ne.s32.totalorder %s670_s17, %s526_s25  ;;  %p531_p9 = scmp.lt.u32.totalorder %s670_s17, %s714_s2 }
 0x183   : > { %p532_p10 = scmp.lt.u32.totalorder %s530_s28, %s526_s25  ;;  %p534_p12 = scmp.lt.u32.totalorder %s526_s25, %s670_s17 }
 0x184   : > { %p528_p7 = pnand %p527_p4, %p634_p5 }
 0x185   : > { %p533_p11 = por %p532_p10, %p531_p9 }
 0x186   : > { %p529_p8 = pneg %p528_p7 }
 0x187   : > { %p535_p13 = por %p534_p12, %p533_p11 }
 0x189   : > { %p536_p0 = pnand %p535_p13, %p529_p8 }
 0x18b   : > { %539 = shalt.err (!%p536_p0)
}
 0x18c   : > { %462 = dma.vmem_to_hbm [thread:$0]  (%p634_p5), %s672_s8, 128, %s670_s17, %s347_s21  }
 0x18d PF: > { %p468_p1 = scmp.ge.s32.totalorder %s574_s12, 2  ;;  %s372_s3 = sand.u32 1, %s562_s9  }
 0x18e   : > { %s373_s4 = scalar_lea.sflag [#allocation4], %s372_s3 }
 0x18f   : > { %p465_p2 = pnand %p468_p1, %p638_p6 }
 0x191   : > { %557 = dma.done.wait (!%p465_p2), %s373_s4, 128  }
 0x192   : > { %559 = vsyncadd (!%p465_p2), %s373_s4, 4294967168  ;;  %p12_p3 = scmp.ge.s32.totalorder %s621_s15, 4   ;;  %s717_s9 = smov %s566_s10 }
 0x193   : > { %s718_s10 = smov %s570_s11  ;;  %s719_s11 = smov %s632_s18 }
 0x194   : > { %s720_s12 = smov %s621_s15  ;;  %14 = sbr.rel (!%p12_p3) target bundleno = 3 (0x3), region = 64 }
 0x19b   :  { %378 = vsyncpa [#allocation4], 1 }
 0x19c   :  { %380 = vsyncpa [#allocation4 + $0x1], 1 }

</bundles_post_ra>
